<compile_context>
chip_gen: v7x
topology: tpu7x:2x2x1
jax: 0.10.0
libtpu: 0.0.40
codegen_flags: <defaults>
</compile_context>

<pallas_src>
import functools
import math

import jax
import jax.numpy as jnp
from jax import lax
from jax.experimental import pallas as pl
from jax.experimental.pallas import tpu as pltpu


def _vmem_capacity_bytes() -> int:
    try:
        return int(pltpu.get_tpu_info().vmem_capacity_bytes)
    except Exception:
        return 64 << 20  # conservative fallback (v7x per-TensorCore VMEM)


def _pick_tile_n(n: int, c: int, in_bytes: int) -> int:
    """Biggest batch-tile that keeps (inputs x2 + f32 temporaries) in VMEM."""
    budget = int(_vmem_capacity_bytes() * 0.6)   # headroom for compiler scratch
    c_pad = max(pl.cdiv(c, 128) * 128, 128)      # lane padding
    # 2x double-buffered input tile + ~4 full-tile f32 temporaries (x, z, ex, ...)
    bytes_per_row = c_pad * (2 * in_bytes + 4 * 4)
    t = budget // bytes_per_row
    t = int(min(t, 8192))
    t -= t % 8
    t = max(t, 8)
    return n if n <= t else t


def _smoothing_loss_kernel(logits_ref, labels_ref, out_ref, *,
                           log_p_true: float, log_p_false: float,
                           use_ce: bool, n_total: int, tile_n: int,
                           needs_mask: bool):
    i = pl.program_id(0)

    x = logits_ref[...].astype(jnp.float32)              # (tn, C), f32 in VMEM
    tn, c = x.shape

    # Numerically stable log-sum-exp pieces (p / log p never built as tiles).
    m = jnp.max(x, axis=1, keepdims=True)                # (tn, 1)
    z = x - m                                            # (tn, C)
    ex = jnp.exp(z)                                      # (tn, C)
    s = jnp.sum(ex, axis=1, keepdims=True)               # (tn, 1)
    logs = jnp.log(s)                                    # (tn, 1)

    # (1, C) class ids broadcast against (tn, 1) labels: no (tn, C) iota tile.
    cls = lax.broadcasted_iota(jnp.int32, (1, c), 1)
    is_true = cls == labels_ref[...]                     # (tn, C) bool

    if needs_mask:
        row = lax.broadcasted_iota(jnp.int32, (tn, 1), 0)
        valid = (i * tile_n + row) < n_total             # (tn, 1)
        n_valid = jnp.minimum(tile_n, n_total - i * tile_n).astype(jnp.float32)
    else:
        valid = None
        n_valid = float(tile_n)

    def mask_rows(v):                                    # v: (tn, 1)
        return jnp.where(valid, v, 0.0) if needs_mask else v

    if use_ce:
        # cross entropy partial: sum_n ( log s[n] - z[n, y_n] )
        z_y = jnp.sum(jnp.where(is_true, z, 0.0), axis=1, keepdims=True)
        partial = jnp.sum(mask_rows(logs - z_y))
    else:
        inv_s = pl.reciprocal(s, approx=False)           # (tn, 1), exact, tiny
        # sum_n p*logp = sum_n( inv_s * sum_c ex*z - log s )
        sum_ex_z = jnp.sum(ex * z, axis=1, keepdims=True)
        row_p_logp = inv_s * sum_ex_z - logs             # (tn, 1)
        # sum_n p*logq = n_valid*log_pF + (log_pT - log_pF) * sum_n p[n, y_n]
        ex_y = jnp.sum(jnp.where(is_true, ex, 0.0), axis=1, keepdims=True)
        row_p_y = ex_y * inv_s                           # (tn, 1)
        sum_p_logp = jnp.sum(mask_rows(row_p_logp))
        p_y_sum = jnp.sum(mask_rows(row_p_y))
        sum_p_logq = n_valid * log_p_false + (log_p_true - log_p_false) * p_y_sum
        partial = sum_p_logp - sum_p_logq

    # Lane-dense splat of this tile's partial; wrapper reads [:, 0, 0].
    out_ref[...] = jnp.broadcast_to(partial.astype(jnp.float32), out_ref.shape)


def smoothing_loss(logits, labels, p_for_true=0.9, num_classes=10,
                   tile_n_override=None):
    assert 1.0 / num_classes < p_for_true <= 1.0
    assert num_classes > 1
    p_for_false = (1.0 - p_for_true) / (num_classes - 1)
    use_ce = (p_for_true == 1.0)

    n, c = logits.shape
    labels2d = labels.reshape(n, 1).astype(jnp.int32)
    in_bytes = jnp.dtype(logits.dtype).itemsize

    tile_n = tile_n_override if tile_n_override is not None else _pick_tile_n(n, c, in_bytes)
    num_tiles = pl.cdiv(n, tile_n)
    needs_mask = (n % tile_n) != 0

    kernel = functools.partial(
        _smoothing_loss_kernel,
        log_p_true=float(math.log(p_for_true)),
        log_p_false=(0.0 if use_ce else float(math.log(p_for_false))),
        use_ce=use_ce,
        n_total=n,
        tile_n=tile_n,
        needs_mask=needs_mask,
    )

    cost = pl.CostEstimate(
        flops=8 * n * c,
        transcendentals=n * c + 2 * n,
        bytes_accessed=n * c * in_bytes + n * 4 + num_tiles * 8 * 128 * 4,
    )

    partials = pl.pallas_call(
        kernel,
        out_shape=jax.ShapeDtypeStruct((num_tiles, 8, 128), jnp.float32),
        grid=(num_tiles,),
        in_specs=[
            pl.BlockSpec((tile_n, c), lambda i: (i, 0)),   # logits tile
            pl.BlockSpec((tile_n, 1), lambda i: (i, 0)),   # labels tile
        ],
        # One lane-dense block per tile (no cross-tile accumulation), so the
        # batch axis is truly parallel -> both TensorCores on v7x.
        out_specs=pl.BlockSpec((1, 8, 128), lambda i: (i, 0, 0)),
        compiler_params=pltpu.CompilerParams(
            dimension_semantics=("parallel",),
            vmem_limit_bytes=int(_vmem_capacity_bytes() * 0.8)),
        cost_estimate=cost,
    )(logits, labels2d)

    scale = (1.0 / n) if use_ce else (1.0 / (n * c))
    return jnp.sum(partials[:, 0, 0]) * scale


def _reference(logits, labels, p_for_true=0.9, num_classes=10):
    # Pure-JAX reference mirroring the PyTorch forward, for sanity checking.
    p_for_false = (1.0 - p_for_true) / (num_classes - 1)
    p = jax.nn.softmax(logits.astype(jnp.float32), axis=1)
    logp = jax.nn.log_softmax(logits.astype(jnp.float32), axis=1)
    if p_for_true == 1.0:
        return jnp.mean(-logp[jnp.arange(logits.shape[0]), labels])
    q = jnp.full_like(p, p_for_false)
    q = q.at[jnp.arange(logits.shape[0]), labels].set(p_for_true)
    return jnp.mean(p * (logp - jnp.log(q)))


if __name__ == "__main__":
    key = jax.random.PRNGKey(0)
    k1, k2, k3 = jax.random.split(key, 3)

    N, C = 8, 10                                  # batch=8, num_classes=10
    logits = jax.random.normal(k1, (N, C), dtype=jnp.float32)
    labels = jax.random.randint(k2, (N,), 0, C, dtype=jnp.int32)

    loss = jax.block_until_ready(smoothing_loss(logits, labels, 0.9, C))
    ref = _reference(logits, labels, 0.9, C)
    assert jnp.allclose(loss, ref, atol=1e-5, rtol=1e-5), (loss, ref)

    # p_for_true == 1 -> cross-entropy branch
    loss_ce = jax.block_until_ready(smoothing_loss(logits, labels, 1.0, C))
    ref_ce = _reference(logits, labels, 1.0, C)
    assert jnp.allclose(loss_ce, ref_ce, atol=1e-5, rtol=1e-5), (loss_ce, ref_ce)

    # bf16 logits streamed from HBM (kernel upcasts to f32 internally)
    logits_bf = logits.astype(jnp.bfloat16)
    loss_bf = jax.block_until_ready(smoothing_loss(logits_bf, labels, 0.9, C))
    ref_bf = _reference(logits_bf.astype(jnp.float32), labels, 0.9, C)
    assert jnp.allclose(loss_bf, ref_bf, atol=1e-4, rtol=1e-4), (loss_bf, ref_bf)

    # multi-tile grid with masked tail tile (N not a multiple of tile_n)
    N2 = 12
    logits2 = jax.random.normal(k3, (N2, C), dtype=jnp.float32)
    labels2 = jax.random.randint(k2, (N2,), 0, C, dtype=jnp.int32)
    loss2 = jax.block_until_ready(
        smoothing_loss(logits2, labels2, 0.9, C, tile_n_override=8))
    ref2 = _reference(logits2, labels2, 0.9, C)
    assert jnp.allclose(loss2, ref2, atol=1e-5, rtol=1e-5), (loss2, ref2)

    print("KERNEL_OK")
</pallas_src>

<mosaic_0001>
module attributes {stable_mosaic.version = 11 : i64} {
  func.func @_smoothing_loss_kernel(%arg0: i32, %arg1: memref<8x10xf32, #tpu.memory_space<vmem>>, %arg2: memref<8x1xi32, #tpu.memory_space<vmem>>, %arg3: memref<1x8x128xf32, #tpu.memory_space<vmem>>) attributes {dimension_semantics = [#tpu.dimension_semantics<parallel>], iteration_bounds = array<i64: 1>, scalar_prefetch = 0 : i64, scratch_operands = 0 : i64, tpu.core_type = #tpu.core_type<tc>, window_params = [{transform_indices = @transform_0, window_bounds = array<i64: 8, 10>}, {transform_indices = @transform_1, window_bounds = array<i64: 8, 1>}, {transform_indices = @transform_2, window_bounds = array<i64: 1, 8, 128>}]} {
    %c0 = arith.constant 0 : index
    %c0_0 = arith.constant 0 : index
    %0 = vector.load %arg1[%c0, %c0_0] : memref<8x10xf32, #tpu.memory_space<vmem>>, vector<8x10xf32>
    %cst = arith.constant dense<0xFF800000> : vector<8xf32>
    %1 = vector.multi_reduction <maximumf>, %0, %cst [1] : vector<8x10xf32> to vector<8xf32>
    %2 = vector.shape_cast %1 : vector<8xf32> to vector<8x1xf32>
    %3 = vector.broadcast %2 : vector<8x1xf32> to vector<8x10xf32>
    %4 = arith.subf %0, %3 : vector<8x10xf32>
    %5 = math.exp %4 : vector<8x10xf32>
    %cst_1 = arith.constant dense<0.000000e+00> : vector<8xf32>
    %6 = vector.multi_reduction <add>, %5, %cst_1 [1] : vector<8x10xf32> to vector<8xf32>
    %7 = vector.shape_cast %6 : vector<8xf32> to vector<8x1xf32>
    %8 = math.log %7 : vector<8x1xf32>
    %9 = tpu.iota {dimensions = array<i32: 1>} : vector<1x10xi32>
    %c0_2 = arith.constant 0 : index
    %c0_3 = arith.constant 0 : index
    %10 = vector.load %arg2[%c0_2, %c0_3] : memref<8x1xi32, #tpu.memory_space<vmem>>, vector<8x1xi32>
    %11 = vector.broadcast %9 : vector<1x10xi32> to vector<8x10xi32>
    %12 = vector.broadcast %10 : vector<8x1xi32> to vector<8x10xi32>
    %13 = arith.cmpi eq, %11, %12 : vector<8x10xi32>
    %14 = tpu.reciprocal %7 : vector<8x1xf32> -> vector<8x1xf32>
    %15 = arith.mulf %5, %4 : vector<8x10xf32>
    %cst_4 = arith.constant dense<0.000000e+00> : vector<8xf32>
    %16 = vector.multi_reduction <add>, %15, %cst_4 [1] : vector<8x10xf32> to vector<8xf32>
    %17 = vector.shape_cast %16 : vector<8xf32> to vector<8x1xf32>
    %18 = arith.mulf %14, %17 : vector<8x1xf32>
    %19 = arith.subf %18, %8 : vector<8x1xf32>
    %cst_5 = arith.constant 0.000000e+00 : f32
    %20 = vector.broadcast %cst_5 : f32 to vector<8x10xf32>
    %21 = arith.select %13, %5, %20 : vector<8x10xi1>, vector<8x10xf32>
    %cst_6 = arith.constant dense<0.000000e+00> : vector<8xf32>
    %22 = vector.multi_reduction <add>, %21, %cst_6 [1] : vector<8x10xf32> to vector<8xf32>
    %23 = vector.shape_cast %22 : vector<8xf32> to vector<8x1xf32>
    %24 = arith.mulf %23, %14 : vector<8x1xf32>
    %25 = vector.shape_cast %19 : vector<8x1xf32> to vector<1x8x1xf32>
    %cst_7 = arith.constant dense<0.000000e+00> : vector<1xf32>
    %26 = vector.multi_reduction <add>, %25, %cst_7 [1, 2] : vector<1x8x1xf32> to vector<1xf32>
    %27 = vector.shape_cast %26 : vector<1xf32> to vector<1x1x1xf32>
    %28 = vector.extract %27[0, 0, 0] : f32 from vector<1x1x1xf32>
    %29 = vector.shape_cast %24 : vector<8x1xf32> to vector<1x8x1xf32>
    %cst_8 = arith.constant dense<0.000000e+00> : vector<1xf32>
    %30 = vector.multi_reduction <add>, %29, %cst_8 [1, 2] : vector<1x8x1xf32> to vector<1xf32>
    %31 = vector.shape_cast %30 : vector<1xf32> to vector<1x1x1xf32>
    %32 = vector.extract %31[0, 0, 0] : f32 from vector<1x1x1xf32>
    %cst_9 = arith.constant 4.39444923 : f32
    %33 = arith.mulf %cst_9, %32 : f32
    %cst_10 = arith.constant -35.9984779 : f32
    %34 = arith.addf %cst_10, %33 : f32
    %35 = arith.subf %28, %34 : f32
    %36 = vector.broadcast %35 : f32 to vector<1x8x128xf32>
    %c0_11 = arith.constant 0 : index
    %c0_12 = arith.constant 0 : index
    %c0_13 = arith.constant 0 : index
    %37 = vector.load %arg3[%c0_11, %c0_12, %c0_13] : memref<1x8x128xf32, #tpu.memory_space<vmem>>, vector<1x8x128xf32>
    tpu.vector_store %arg3[%c0_11, %c0_12, %c0_13], %36 {strides = array<i32>} : memref<1x8x128xf32, #tpu.memory_space<vmem>>, vector<1x8x128xf32>,
    return
  }
  func.func @transform_0(%arg0: i32) -> (i32, i32) {
    %c0_i32 = arith.constant 0 : i32
    %c0_i32_0 = arith.constant 0 : i32
    return %arg0, %c0_i32 : i32, i32
  }
  func.func @transform_1(%arg0: i32) -> (i32, i32) {
    %c0_i32 = arith.constant 0 : i32
    %c0_i32_0 = arith.constant 0 : i32
    return %arg0, %c0_i32 : i32, i32
  }
  func.func @transform_2(%arg0: i32) -> (i32, i32, i32) {
    %c0_i32 = arith.constant 0 : i32
    %c0_i32_0 = arith.constant 0 : i32
    %c0_i32_1 = arith.constant 0 : i32
    return %arg0, %c0_i32, %c0_i32_0 : i32, i32, i32
  }
}

</mosaic_0001>

<bundles_post_ra>
// kernel: tpu_custom_call.1
= control target key start
LH: loop header
LB: loop body
LE: loop exit
PB: predicated region body
PF: predicated region fallthrough
CT: control target
= control target key end

     0   :  { %vm13_vm0 = vcmask 80896   ;;  %s160_s0 = inlined_call_operand.vmem [shape: f32[8,10], index: 0, kind: input, shape index: {}]   ;;  %s161_s1 = inlined_call_operand.vmem [shape: s32[8,1], index: 1, kind: input, shape index: {}]   ;;  %s162_s2 = inlined_call_operand.hbm [shape: f32[1,8,128], index: 2, kind: output, shape index: {}]  }
   0x1   :  { %v12_v0 = vld [vmem:[%s160_s0] sm:$0xff] }
   0x2   :  { %7 = vsyncpa [#allocation3], 0  ;;  %v14_v1 = vsel %vm13_vm0, %v12_v0, -inf  ;;  %v121_v2 = vmov 0   ;;  %v27_v3 = vld [vmem:[%s161_s1] sm:$0xff]  ;;  %v25_v7 = vlaneseq  ;;  %vm44_vm2 = vcmask 7168  }
   0x3   :  { %90 = vset.pattern.permute.xlu0 %v121_v2  ;;  %s122_s15 = smov [#allocation2]  }
   0x4   :  { %15 = vmax.xlane.f32.xlu0 %v14_v1  ;;  %v26_v8 = vand.u32 127, %v25_v7  ;;  %s76_s16 = sshll.u32 %s122_s15, 4  ;;  %s77_s16 = int_to_ptr.vmem [resolvable:$true] %s76_s16 }
   0x5   :  { %s97_s18 = scalar_lea.vmem %s77_s16, 128  ;;  %p102_p1 = scmp.lt.s32.totalorder %s77_s16, %s77_s16 }
   0x6   :  { %p98_p0 = scmp.ne.s32.totalorder %s77_s16, %s97_s18  ;;  %p103_p2 = scmp.lt.s32.totalorder %s97_s18, %s97_s18 }
   0x8   :  { %p104_p3 = por %p103_p2, %p102_p1 }
   0xa   :  { %p105_p4 = pnand %p104_p3, %p98_p0 }
  0x1a   :  { %29 = vperm.xlu0 %90, %v27_v3  }
  0x91   :  { %v16_v4 = vpop.xlane.xlu0 %15 }
  0x92   :  { %v17_v5 = vsub.f32 %v12_v0, %v16_v4 }
  0x94   :  { %v18_v6 = vmul.f32 1.442695, %v17_v5 }
  0x96   :  { %91 = vpow2.f32 %v18_v6 }
  0x99   :  { %v30_v10 = vpop.permute.xlu0 %29 }
  0x9a   :  { %vm31_vm1 = vcmp.eq.s32.totalorder %v26_v8, %v30_v10 }
  0xa0   :  { %v92_v9 = vpop.eup %91 }
  0xa1   :  { %v20_v11 = vsel %vm13_vm0, %v92_v9, 0.0  ;;  %v33_v12 = vmul.f32 %v92_v9, %v17_v5  ;;  %v39_v14 = vsel %vm31_vm1, %v92_v9, 0.0 }
  0xa2   :  { %21 = vadd.xlane.f32.xlu1 %v20_v11  ;;  %v40_v15 = vsel %vm13_vm0, %v39_v14, 0.0 }
  0xa3   :  { %v34_v13 = vsel %vm13_vm0, %v33_v12, 0.0 }
  0xa6   :  { %35 = vadd.xlane.f32.xlu1 %v34_v13 }
  0xaa   :  { %41 = vadd.xlane.f32.xlu1 %v40_v15 }
 0x12f   :  { %v22_v16 = vpop.xlane.xlu1 %21 }
 0x130   :  { %93 = vlog2.f32 %v22_v16 }
 0x131   :  { %95 = vrcp.f32 %v22_v16 }
 0x133   :  { %v36_v17 = vpop.xlane.xlu1 %35 }
 0x137   :  { %v42_v23 = vpop.xlane.xlu1 %41 }
 0x13a   :  { %v94_v18 = vpop.eup %93 }
 0x13b   :  { %v96_v19 = vpop.eup %95  ;;  %v24_v20 = vmul.f32 0.6931472, %v94_v18 }
 0x13c   :  { %v37_v21 = vmul.f32 %v96_v19, %v36_v17  ;;  %v43_v24 = vmul.f32 %v96_v19, %v42_v23 }
 0x13e   :  { %v38_v22 = vsub.f32 %v37_v21, %v24_v20  ;;  %v55_v26 = vsel %vm44_vm2, %v43_v24, 0.0 }
 0x140   :  { %v45_v25 = vsel %vm44_vm2, %v38_v22, 0.0 }
 0x141   :  { %46 = vadd.xlane.f32.xlu1 %v45_v25 }
 0x145   :  { %56 = vadd.xlane.f32.xlu1 %v55_v26 }
 0x1ce   :  { %v47_v27 = vpop.xlane.xlu1 %46 }
 0x1cf   :  { %v48_v28 = vrot.slane %v47_v27, 4 }
 0x1d1   :  { %v49_v29 = vadd.f32 %v48_v28, %v47_v27 }
 0x1d2   :  { %v57_v30 = vpop.xlane.xlu1 %56 }
 0x1d3   :  { %v50_v31 = vrot.slane %v49_v29, 2  ;;  %v58_v32 = vrot.slane %v57_v30, 4 }
 0x1d5   :  { %v59_v33 = vadd.f32 %v58_v32, %v57_v30  ;;  %v51_v34 = vadd.f32 %v50_v31, %v49_v29 }
 0x1d7   :  { %v60_v35 = vrot.slane %v59_v33, 2  ;;  %v52_v36 = vrot.slane %v51_v34, 1 }
 0x1d9   :  { %v61_v37 = vadd.f32 %v60_v35, %v59_v33  ;;  %v53_v38 = vadd.f32 %v52_v36, %v51_v34 }
 0x1db   :  { %84 = vpush %v53_v38  ;;  %v62_v39 = vrot.slane %v61_v37, 1 }
 0x1dd   :  { %v63_v40 = vadd.f32 %v62_v39, %v61_v37 }
 0x1df   :  { %86 = vpush %v63_v40 }
 0x20c   :  { %s85_s0 = spop %84 }
 0x210   :  { %s87_s1 = spop %86 }
 0x211   :  { %s65_s13 = smul.f32 4.394449, %s87_s1 }
 0x213   :  { %s66_s14 = sadd.f32 -35.998478, %s65_s13 }
 0x215   :  { %s67_s17 = ssub.f32 %s85_s0, %s66_s14 }
 0x217   :  { %v68_v41 = vstv %s67_s17 }
 0x218   :  { %69 = vst [vmem:[#allocation2] sm:$0xff] %v68_v41 }
 0x219   :  { %108 = shalt.err (!%p105_p4)
}
 0x21a   :  { %s109_s21 = scalar_lea.hbm %s162_s2, 128 }
 0x21b   :  { %p110_p5 = scmp.ne.s32.totalorder %s162_s2, %s109_s21  ;;  %p113_p6 = scmp.lt.u32.totalorder %s109_s21, %s162_s2 }
 0x21d   :  { %p115_p7 = pnand %p113_p6, %p110_p5 }
 0x21f   :  { %118 = shalt.err (!%p115_p7)
}
 0x220   :  { %79 = dma.vmem_to_hbm [thread:$0]  %s77_s16, 128, %s162_s2, [#allocation3]  }
 0x221   :  { %119 = dma.done.wait [#allocation3], 128  }
 0x222   :  { %120 = vsyncadd [#allocation3], 4294967168 }
 0x223   :  { %83 = vsyncpa [#allocation3], 1 }

</bundles_post_ra>
